<compile_context>
chip_gen: v6e
topology: v6e:2x2x1
jax: 0.10.0
libtpu: 0.0.40
codegen_flags: <defaults>
</compile_context>

<pallas_src>
import numpy as np
import jax
import jax.numpy as jnp
from jax.experimental import pallas as pl
from jax.experimental.pallas import tpu as pltpu

_LANE = 128
# Contract dim 1 of both (M, tk) operands: A @ B.T.  Same dimension-number
# pattern flash-attention uses for q @ k.T, which Mosaic lowers without a
# per-step relayout of the tk-wide operand (review item: verified pattern).
_DN = (((1,), (1,)), ((), ()))

_VMEM_LIMIT_CACHE = None


def _vmem_limit_bytes():
    """Generation-aware scoped-VMEM budget (leaves compiler headroom).

    v7x has 64 MiB of physical VMEM per TensorCore; v5e/v6e have 128 MiB.
    """
    global _VMEM_LIMIT_CACHE
    if _VMEM_LIMIT_CACHE is None:
        try:
            cap = int(pltpu.get_tpu_info().vmem_capacity_bytes)
        except Exception:
            cap = 64 * 1024 * 1024          # assume the tightest chip (v7x)
        _VMEM_LIMIT_CACHE = max(32 << 20, min(cap - (16 << 20), 100 << 20))
    return _VMEM_LIMIT_CACHE


def _choose_tiling(m, k, tk_max):
    """Pick (k_padded, tk, nk).

    tk is either the full (padded) K or a 128 multiple dividing it, so the
    BlockSpec (8,128) rule always holds; the x tile is capped at ~2 MiB per
    pipeline buffer.  If no aligned divisor <= tk_max exists, K is zero-padded
    to a 128 multiple (padded columns add exact zeros to every gram) instead
    of letting the tile balloon to the full K.
    """
    cols_budget = max(_LANE, ((2 << 20) // (4 * max(m, 1))) // _LANE * _LANE)
    tk_max = max(_LANE, min(int(tk_max), cols_budget))
    if k <= tk_max:
        return k, k, 1
    top = (tk_max // _LANE) * _LANE
    t = top
    while t >= _LANE:
        if k % t == 0:
            return k, t, k // t
        t -= _LANE
    k_pad = _LANE * pl.cdiv(k, _LANE)
    t = top
    while t >= _LANE and k_pad % t:
        t -= _LANE
    return k_pad, t, k_pad // t


def _half_mask(k, k_pad, tk, nk, w, center, which):
    """Resident 0/1 column mask, one row per K step.

    Built once on the host (trace-time), so the kernel never runs the
    iota / integer-mod / compare sequence in its steady-state loop.
    """
    cols = np.arange(k_pad, dtype=np.int64)
    sel = ((cols % w) < center) if which == 0 else ((cols % w) >= center)
    sel &= cols < k                          # padded tail selects nothing
    return jnp.asarray(sel.astype(np.float32).reshape(nk, tk))


def _x_block_spec(m, tk, input_buffering):
    idx = lambda kk: (0, kk)
    if input_buffering and int(input_buffering) > 2:
        # Optional deeper input pipelining for the HBM-bound small-M regime.
        return pl.BlockSpec((m, tk), idx,
                            pipeline_mode=pl.Buffered(int(input_buffering)))
    return pl.BlockSpec((m, tk), idx)


# ----------------------------- kernels ------------------------------------ #

def _make_gram_kernel(norm, mxu_dtype):
    """Gram of one W-half, accumulated over the K grid axis directly into the
    resident output block; scaled in place on the last step (no acc scratch)."""

    def kernel(mask_ref, t_ref, g_ref):
        kk = pl.program_id(0)

        @pl.when(kk == 0)
        def _init():
            g_ref[...] = jnp.zeros_like(g_ref)

        f = t_ref[...].astype(jnp.float32)
        fh = f * mask_ref[pl.ds(kk, 1), :]       # 0/1 row mask, broadcast over M
        # One-sided mask: the zeroed columns of `fh` annihilate the matching
        # columns of `f`, so dot(fh, f) == dot(fh, fh) for finite inputs.
        g_ref[...] += jax.lax.dot_general(
            fh.astype(mxu_dtype), f.astype(mxu_dtype),
            dimension_numbers=_DN, preferred_element_type=jnp.float32)

        @pl.when(kk == pl.num_programs(0) - 1)
        def _fin():
            g_ref[...] *= jnp.float32(norm)

    return kernel


def _make_loss_kernel(norm1, norm2, inv_mm, mxu_dtype):
    """loss = MSE(gram(left half), gt1) + MSE(gram(right half), gt2).

    Per K tile: two MXU pushes (left-masked gram, full gram) and a single
    select; the right-half gram is recovered as full - left at finalize
    (cross terms are exact zeros for finite inputs), so there is no second
    mask and no (2M, tk) concatenate copy in the steady-state loop.
    """

    def kernel(mask_ref, x_ref, gt1_ref, gt2_ref, loss_ref, acc1_ref, accf_ref):
        kk = pl.program_id(0)

        @pl.when(kk == 0)
        def _init():
            acc1_ref[...] = jnp.zeros_like(acc1_ref)
            accf_ref[...] = jnp.zeros_like(accf_ref)

        f = x_ref[...].astype(jnp.float32)
        a = f.astype(mxu_dtype)
        f1 = (f * mask_ref[pl.ds(kk, 1), :]).astype(mxu_dtype)
        acc1_ref[...] += jax.lax.dot_general(
            f1, a, dimension_numbers=_DN, preferred_element_type=jnp.float32)
        accf_ref[...] += jax.lax.dot_general(
            a, a, dimension_numbers=_DN, preferred_element_type=jnp.float32)

        @pl.when(kk == pl.num_programs(0) - 1)
        def _fin():
            g1 = acc1_ref[...]
            g2 = accf_ref[...] - g1
            d1 = g1 * jnp.float32(norm1) - gt1_ref[...]
            d2 = g2 * jnp.float32(norm2) - gt2_ref[...]
            loss_ref[0, 0] = (jnp.sum(d1 * d1) + jnp.sum(d2 * d2)) * jnp.float32(inv_mm)

    return kernel


# ----------------------------- wrappers ------------------------------------ #

def gram_matrix_pallas(t_nchw, center, which, tk_max=4096,
                       mxu_dtype=jnp.float32, input_buffering=2):
    """Gram of the left (which=0) / right (which=1) W-half of an NCHW tensor,
    matching the torch module's gram_matrix + normalization."""
    b, c, h, w = t_nchw.shape
    if not (0 < center < w):
        raise ValueError(f"degenerate split: center={center}, W={w}")
    m, k = b * c, h * w
    cols = center if which == 0 else (w - center)
    norm = 1.0 / float(m * h * cols)

    k_pad, tk, nk = _choose_tiling(m, k, tk_max)
    t2d = t_nchw.reshape(m, k)                       # contiguous reshape: free
    if k_pad != k:
        t2d = jnp.pad(t2d, ((0, 0), (0, k_pad - k)))  # rare fallback path
    mask = _half_mask(k, k_pad, tk, nk, w, center, which)

    return pl.pallas_call(
        _make_gram_kernel(norm, mxu_dtype),
        out_shape=jax.ShapeDtypeStruct((m, m), jnp.float32),
        grid_spec=pltpu.PrefetchScalarGridSpec(
            num_scalar_prefetch=0,
            grid=(nk,),
            in_specs=[
                pl.BlockSpec((nk, tk), lambda kk: (0, 0)),   # resident mask
                _x_block_spec(m, tk, input_buffering),
            ],
            out_specs=pl.BlockSpec((m, m), lambda kk: (0, 0)),
        ),
        compiler_params=pltpu.CompilerParams(
            dimension_semantics=("arbitrary",),
            vmem_limit_bytes=_vmem_limit_bytes()),
    )(mask, t2d)


def twice_style_loss_pallas(x_nchw, gt1, gt2, center, tk_max=4096,
                            mxu_dtype=jnp.float32, input_buffering=2):
    """Pure function: returns the scalar TwiceStyleLoss.  jit/grad friendly."""
    b, c, h, w = x_nchw.shape
    if not (0 < center < w):
        raise ValueError(f"degenerate split: center={center}, W={w}")
    m, k = b * c, h * w
    assert gt1.shape == (m, m) and gt2.shape == (m, m)
    norm1 = 1.0 / float(m * h * center)
    norm2 = 1.0 / float(m * h * (w - center))
    inv_mm = 1.0 / float(m * m)

    k_pad, tk, nk = _choose_tiling(m, k, tk_max)
    x2d = x_nchw.reshape(m, k)                       # contiguous reshape: free
    if k_pad != k:
        x2d = jnp.pad(x2d, ((0, 0), (0, k_pad - k)))
    mask = _half_mask(k, k_pad, tk, nk, w, center, which=0)   # left-half mask

    # gt1/gt2 are only read at the final step; for very large M move the MSE
    # epilogue out of the kernel to free their VMEM residency (v7x, 64 MiB).
    loss = pl.pallas_call(
        _make_loss_kernel(norm1, norm2, inv_mm, mxu_dtype),
        out_shape=jax.ShapeDtypeStruct((1, 1), jnp.float32),
        grid_spec=pltpu.PrefetchScalarGridSpec(
            num_scalar_prefetch=0,
            grid=(nk,),
            in_specs=[
                pl.BlockSpec((nk, tk), lambda kk: (0, 0)),   # resident mask
                _x_block_spec(m, tk, input_buffering),
                pl.BlockSpec((m, m), lambda kk: (0, 0)),     # gt1 (resident)
                pl.BlockSpec((m, m), lambda kk: (0, 0)),     # gt2 (resident)
            ],
            out_specs=pl.BlockSpec((1, 1), lambda kk: (0, 0)),
            scratch_shapes=[pltpu.VMEM((m, m), jnp.float32),   # left-half gram
                            pltpu.VMEM((m, m), jnp.float32)],  # full gram
        ),
        compiler_params=pltpu.CompilerParams(
            dimension_semantics=("arbitrary",),
            vmem_limit_bytes=_vmem_limit_bytes()),
    )(mask, x2d, gt1, gt2)
    return loss[0, 0]


class TwiceStyleLoss:
    """JAX/Pallas equivalent of the PyTorch TwiceStyleLoss module.

    self.loss is a Python-side convenience attribute (eager use).  Under
    jit/grad, call twice_style_loss_pallas(...) directly and use its return
    value instead of the attribute.
    """

    def __init__(self, target1, target2, tk_max=4096,
                 mxu_dtype=jnp.float32, input_buffering=2):
        self.tk_max = tk_max
        self.mxu_dtype = mxu_dtype
        self.input_buffering = input_buffering
        self.center = int(target1.shape[3]) // 2
        self.g_target1 = gram_matrix_pallas(
            target1, self.center, 0, tk_max, mxu_dtype, input_buffering)
        self.g_target2 = gram_matrix_pallas(
            target2, self.center, 1, tk_max, mxu_dtype, input_buffering)
        self.loss1 = jnp.float32(0.0)   # MSE(g, g) == 0
        self.loss2 = jnp.float32(0.0)
        self.loss = self.loss1 + self.loss2

    def __call__(self, x):
        self.loss = twice_style_loss_pallas(
            x, self.g_target1, self.g_target2, self.center,
            self.tk_max, self.mxu_dtype, self.input_buffering)
        return x  # forward returns its input unchanged, like the torch module


# ----------------------------- reference ----------------------------------- #

def _gram_ref(x_nchw, sl):
    b, c, h, _ = x_nchw.shape
    xs = x_nchw[:, :, :, sl]
    wh = xs.shape[3]
    f = xs.reshape(b * c, h * wh)
    g = jnp.dot(f, f.T, precision=jax.lax.Precision.HIGHEST)
    return g / (b * c * h * wh)


def _loss_ref(x, gt1, gt2, center):
    g1 = _gram_ref(x, slice(None, center))
    g2 = _gram_ref(x, slice(center, None))
    return jnp.mean((g1 - gt1) ** 2) + jnp.mean((g2 - gt2) ** 2)


def _check(B, C, H, W, tk_max):
    key = jax.random.PRNGKey(0)
    k1, k2, k3 = jax.random.split(key, 3)
    target1 = jax.random.normal(k1, (B, C, H, W), dtype=jnp.float32)
    target2 = jax.random.normal(k2, (B, C, H, W), dtype=jnp.float32)
    x = jax.random.normal(k3, (B, C, H, W), dtype=jnp.float32)

    module = TwiceStyleLoss(target1, target2, tk_max=tk_max)
    out = module(x)
    jax.block_until_ready(out)
    jax.block_until_ready(module.loss)

    # target grams
    gt1_ref = _gram_ref(target1, slice(None, module.center))
    gt2_ref = _gram_ref(target2, slice(module.center, None))
    assert jnp.allclose(module.g_target1, gt1_ref, rtol=1e-5, atol=1e-6)
    assert jnp.allclose(module.g_target2, gt2_ref, rtol=1e-5, atol=1e-6)

    # forward semantics + loss
    ref = _loss_ref(x, gt1_ref, gt2_ref, module.center)
    assert jnp.allclose(out, x), "forward must return x unchanged"
    assert jnp.allclose(module.loss, ref, rtol=1e-5, atol=1e-6), (
        module.loss, ref)


# ------------------------------- main --------------------------------------- #

if __name__ == "__main__":
    # Multi-step K grid: K=256, tk=128 -> exercises resident mask + accumulators.
    _check(B=2, C=4, H=16, W=16, tk_max=128)
    # Odd W, single full-row step; per-half normalization differs (8 vs 7 cols).
    _check(B=2, C=4, H=16, W=15, tk_max=4096)
    # K=272 has no 128-aligned divisor <= tk_max: zero-pad fallback path.
    _check(B=2, C=4, H=16, W=17, tk_max=128)
    print("KERNEL_OK")
</pallas_src>

<mosaic_0001>
module attributes {stable_mosaic.version = 11 : i64} {
  func.func @kernel(%arg0: i32, %arg1: memref<2x128xf32, #tpu.memory_space<vmem>>, %arg2: memref<8x128xf32, #tpu.memory_space<vmem>>, %arg3: memref<8x8xf32, #tpu.memory_space<vmem>>) attributes {dimension_semantics = [#tpu.dimension_semantics<arbitrary>], iteration_bounds = array<i64: 2>, scalar_prefetch = 0 : i64, scratch_operands = 0 : i64, tpu.core_type = #tpu.core_type<tc>, window_params = [{pipeline_mode = #tpu.pipeline_mode<synchronous>, transform_indices = @transform_0, window_bounds = array<i64: 2, 128>}, {transform_indices = @transform_1, window_bounds = array<i64: 8, 128>}, {pipeline_mode = #tpu.pipeline_mode<synchronous>, transform_indices = @transform_2, window_bounds = array<i64: 8, 8>}]} {
    %c0_i32 = arith.constant 0 : i32
    %0 = arith.cmpi eq, %arg0, %c0_i32 : i32
    %1 = arith.extui %0 : i1 to i32
    %c0_i32_0 = arith.constant 0 : i32
    %2 = arith.cmpi ne, %1, %c0_i32_0 : i32
    scf.if %2 {
      %cst_8 = arith.constant 0.000000e+00 : f32
      %15 = vector.broadcast %cst_8 : f32 to vector<8x8xf32>
      %c0_9 = arith.constant 0 : index
      %c0_10 = arith.constant 0 : index
      %16 = vector.load %arg3[%c0_9, %c0_10] : memref<8x8xf32, #tpu.memory_space<vmem>>, vector<8x8xf32>
      tpu.vector_store %arg3[%c0_9, %c0_10], %15 {strides = array<i32>} : memref<8x8xf32, #tpu.memory_space<vmem>>, vector<8x8xf32>,
    } else {
    }
    %c0 = arith.constant 0 : index
    %c0_1 = arith.constant 0 : index
    %3 = vector.load %arg2[%c0, %c0_1] : memref<8x128xf32, #tpu.memory_space<vmem>>, vector<8x128xf32>
    %4 = arith.index_cast %arg0 : i32 to index
    %c0_2 = arith.constant 0 : index
    %5 = vector.load %arg1[%4, %c0_2] : memref<2x128xf32, #tpu.memory_space<vmem>>, vector<1x128xf32>
    %6 = vector.broadcast %5 : vector<1x128xf32> to vector<8x128xf32>
    %7 = arith.mulf %3, %6 : vector<8x128xf32>
    %c0_3 = arith.constant 0 : index
    %c0_4 = arith.constant 0 : index
    %8 = vector.load %arg3[%c0_3, %c0_4] : memref<8x8xf32, #tpu.memory_space<vmem>>, vector<8x8xf32>
    %cst = arith.constant dense<0.000000e+00> : vector<8x8xf32>
    %9 = tpu.matmul %7, %3, %cst {dimension_numbers = #tpu.dot_dimension_numbers<[1], [1], [0], [0], [0, 0, 1, 0], [], []>} : vector<8x128xf32>, vector<8x128xf32>, vector<8x8xf32> -> vector<8x8xf32>
    %10 = arith.addf %8, %9 : vector<8x8xf32>
    %c0_5 = arith.constant 0 : index
    %c0_6 = arith.constant 0 : index
    %11 = vector.load %arg3[%c0_5, %c0_6] : memref<8x8xf32, #tpu.memory_space<vmem>>, vector<8x8xf32>
    tpu.vector_store %arg3[%c0_5, %c0_6], %10 {strides = array<i32>} : memref<8x8xf32, #tpu.memory_space<vmem>>, vector<8x8xf32>,
    %c1_i32 = arith.constant 1 : i32
    %12 = arith.cmpi eq, %arg0, %c1_i32 : i32
    %13 = arith.extui %12 : i1 to i32
    %c0_i32_7 = arith.constant 0 : i32
    %14 = arith.cmpi ne, %13, %c0_i32_7 : i32
    scf.if %14 {
      %c0_8 = arith.constant 0 : index
      %c0_9 = arith.constant 0 : index
      %15 = vector.load %arg3[%c0_8, %c0_9] : memref<8x8xf32, #tpu.memory_space<vmem>>, vector<8x8xf32>
      %cst_10 = arith.constant 9.765625E-4 : f32
      %16 = vector.broadcast %cst_10 : f32 to vector<8x8xf32>
      %17 = arith.mulf %15, %16 : vector<8x8xf32>
      %c0_11 = arith.constant 0 : index
      %c0_12 = arith.constant 0 : index
      %18 = vector.load %arg3[%c0_11, %c0_12] : memref<8x8xf32, #tpu.memory_space<vmem>>, vector<8x8xf32>
      tpu.vector_store %arg3[%c0_11, %c0_12], %17 {strides = array<i32>} : memref<8x8xf32, #tpu.memory_space<vmem>>, vector<8x8xf32>,
    } else {
    }
    return
  }
  func.func @transform_0(%arg0: i32) -> (i32, i32) {
    %c0_i32 = arith.constant 0 : i32
    %c0_i32_0 = arith.constant 0 : i32
    %c0_i32_1 = arith.constant 0 : i32
    return %c0_i32, %c0_i32_0 : i32, i32
  }
  func.func @transform_1(%arg0: i32) -> (i32, i32) {
    %c0_i32 = arith.constant 0 : i32
    %c0_i32_0 = arith.constant 0 : i32
    return %c0_i32, %arg0 : i32, i32
  }
  func.func @transform_2(%arg0: i32) -> (i32, i32) {
    %c0_i32 = arith.constant 0 : i32
    %c0_i32_0 = arith.constant 0 : i32
    %c0_i32_1 = arith.constant 0 : i32
    return %c0_i32, %c0_i32_0 : i32, i32
  }
}

</mosaic_0001>

<bundles_post_ra>
// kernel: tpu_custom_call.1
= control target key start
LH: loop header
LB: loop body
LE: loop exit
PB: predicated region body
PF: predicated region fallthrough
CT: control target
= control target key end

     0   :  { %7 = vsyncpa [#allocation3], 0  ;;  %s694_s0 = inlined_call_operand.hbm [shape: f32[2,128], index: 0, kind: input, shape index: {}]   ;;  %s695_s1 = inlined_call_operand.hbm [shape: f32[8,256], index: 1, kind: input, shape index: {}]   ;;  %s696_s2 = inlined_call_operand.hbm [shape: f32[8,8], index: 2, kind: output, shape index: {}]  }
   0x1   :  { %8 = vsyncpa [#allocation6], 0 }
   0x2   :  { %10 = vsyncpa [#allocation6 + $0x1], 0 }
   0x3   :  { %11 = vsyncpa [#allocation4], 0  ;;  %s556_s9 = smov 0   ;;  %s558_s10 = smov 0  }
   0x4   :  { %s560_s11 = smov 0   ;;  %s562_s12 = smov 0  }
   0x5 LB: > { %s575_s13 = sadd.s32 4294967295, %s533_s12   ;;  %p58_p0 = scmp.ne.s32.totalorder %s525_s10, %s521_s9  ;;  %s533_s12 = sphi %s562_s12, %s713_s12   ;;  %s529_s11 = sphi %s560_s11, %s712_s11   ;;  %s525_s10 = sphi %s558_s10, %s711_s10   ;;  %s521_s9 = sphi %s556_s9, %s710_s9  }
   0x6   : > { %p697_p1 = scmp.eq.s32.totalorder %s575_s13, 0  ;;  %p326_p2 = scmp.ge.s32.totalorder %s533_s12, 1 }
   0x7   : > { %p90_p3 = scmp.lt.s32.totalorder %s533_s12, 3  ;;  %s535_s16 = smov [#allocation2]  }
   0x8   : > { %p584_p5 = por %p697_p1, %p58_p0  ;;  %s103_s17 = sshll.u32 %s535_s16, 4  ;;  %s104_s17 = int_to_ptr.vmem [resolvable:$true] %s103_s17 }
   0x9   : > { %p588_p6 = pnand %p326_p2, %p90_p3  ;;  %s595_s18 = sadd.s32 1, %s533_s12  }
   0xa   : > { %s700_s14 = scalar_select %p584_p5, 1, 0 }
   0xb   : > { %s701_s15 = scalar_select %p588_p6, 1, 0 }
   0xc   : > { %p363_p7 = pneg %p588_p6  ;;  %s42_s20 = ssub.s32 %s533_s12, %s595_s18 }
   0xd   : > { %p605_p9 = scmp.eq.s32.totalorder %s42_s20, 0  ;;  %s45_s22 = sadd.s32 1, %s529_s11 }
   0xe   : > { %p599_p8 = pnand %p363_p7, %p697_p1  ;;  %p52_p10 = scmp.ne.s32.totalorder %s529_s11, %s525_s10 }
   0xf   : > { %s424_s23 = scalar_lea.vmem %s104_s17, 32  ;;  %p432_p2 = scmp.lt.s32.totalorder %s104_s17, %s104_s17 }
  0x10   : > { %p415_p11 = pneg %p599_p8  ;;  %p425_p12 = scmp.ne.s32.totalorder %s104_s17, %s424_s23 }
  0x11   : > { %p433_p3 = scmp.lt.s32.totalorder %s424_s23, %s424_s23 }
  0x12   : > { %p427_p13 = pnand %p425_p12, %p415_p11 }
  0x13   : > { %p434_p7 = por %p433_p3, %p432_p2 }
  0x14   : > { %p428_p0 = pneg %p427_p13 }
  0x16   : > { %p435_p4 = pnand %p434_p7, %p428_p0 }
  0x18   : > { %438 = shalt.err (!%p435_p4)
}
  0x19   : > { %366 = dma.hbm_to_vmem [thread:$0]  (!%p599_p8), %s694_s0, 32, %s104_s17, [#allocation3]  }
  0x1a   : > { %s622_s26 = scalar_select %p605_p9, %s529_s11, %s45_s22  }
  0x1b   : > { %p53_p11 = scmp.eq.s32.totalorder %s533_s12, 0  ;;  %p372_p12 = scmp.lt.s32.totalorder %s533_s12, 2 }
  0x1c   : > { %s114_s27 = sand.u32 1, %s529_s11   ;;  %s330_s28 = sshll.u32 %s533_s12, 7 }
  0x1d   : > { %p54_p4 = por %p53_p11, %p52_p10  ;;  %s329_s29 = sshll.u32 %s114_s27, 3 }
  0x1e   : > { %s634_s4 = scalar_lea.hbm %s695_s1, %s330_s28  ;;  %s118_s6 = scalar_lea.vmem [#allocation5], %s329_s29 }
  0x1f   : > { %p636_p13 = pnand %p372_p12, %p54_p4  ;;  %s125_s7 = sshll.u32 %s118_s6, 4  ;;  %s126_s7 = int_to_ptr.vmem [resolvable:$true] %s125_s7 }
  0x20   : > { %s115_s8 = scalar_lea.sflag [#allocation6], %s114_s27  ;;  %s439_s9 = scalar_lea.hbm %s634_s4, 128 }
  0x21   : > { %p440_p8 = scmp.ne.s32.totalorder %s634_s4, %s439_s9  ;;  %p441_p9 = pneg %p636_p13 }
  0x22   : > { %s444_s19 = scalar_lea.hbm %s695_s1, 256  ;;  %p445_p2 = scmp.lt.s32.totalorder %s634_s4, %s695_s1 }
  0x23   : > { %p442_p10 = pnand %p441_p9, %p440_p8  ;;  %p446_p3 = scmp.lt.s32.totalorder %s444_s19, %s439_s9 }
  0x25   : > { %p443_p0 = pneg %p442_p10  ;;  %p447_p7 = por %p446_p3, %p445_p2 }
  0x27   : > { %p448_p11 = pnand %p447_p7, %p443_p0 }
  0x29   : > { %451 = shalt.err (!%p448_p11)
}
  0x2a   : > { %s452_s22 = scalar_lea.vmem %s126_s7, 128  ;;  %s536_s23 = smov [#allocation5]  }
  0x2b   : > { %p453_p12 = scmp.ne.s32.totalorder %s126_s7, %s452_s22  ;;  %s457_s24 = sshll.u32 %s536_s23, 4  ;;  %s458_s24 = int_to_ptr.vmem [resolvable:$false] %s457_s24 }
  0x2c   : > { %s459_s25 = scalar_lea.vmem %s458_s24, 256  ;;  %p460_p8 = scmp.lt.s32.totalorder %s126_s7, %s458_s24 }
  0x2d   : > { %p455_p4 = pnand %p453_p12, %p441_p9  ;;  %p461_p10 = scmp.lt.s32.totalorder %s459_s25, %s452_s22 }
  0x2f   : > { %p456_p1 = pneg %p455_p4  ;;  %p462_p5 = por %p461_p10, %p460_p8 }
  0x31   : > { %p463_p6 = pnand %p462_p5, %p456_p1 }
  0x33   : > { %466 = shalt.err (!%p463_p6)
}
  0x34   : > { %370 = dma.hbm_to_vmem [thread:$0]  (!%p636_p13), %s634_s4, 128, %s126_s7, %s115_s8  }
  0x35   : > { %p705_p0 = scmp.ne.s32.totalorder %s701_s15, 0 }
  0x36   : > { %p706_p2 = scmp.eq.s32.totalorder (!%p705_p0), %s575_s13, 0 }
  0x37   : > { %134 = sbr.rel (%p705_p0) target bundleno = 300 (0x12c), region = 28 }
  0x3c   : > { %508 = dma.done.wait (%p706_p2), [#allocation3], 32   ;;  %p707_p9 = pmov %p706_p2 }
  0x3d   : > { %s140_s27 = sand.u32 1, %s525_s10   ;;  %p708_p1 = scmp.ne.s32.totalorder %s700_s14, 0 }
  0x3e   : > { %510 = vsyncadd (%p707_p9), [#allocation3], 4294967264  ;;  %s333_s28 = sshll.u32 %s140_s27, 3  ;;  %s141_s29 = scalar_lea.sflag [#allocation6], %s140_s27 }
  0x3f   : > { %s144_s30 = scalar_lea.vmem [#allocation5], %s333_s28 }
  0x40   : > { %512 = dma.done.wait (%p708_p1), %s141_s29, 128  }
  0x41   : > { %514 = vsyncadd (%p708_p1), %s141_s29, 4294967168  ;;  %p709_p5 = scmp.ne.s32.totalorder %s575_s13, 0 }
  0x43   : > { %163 = sbr.rel (%p709_p5) target bundleno = 74 (0x4a), region = 40 }
  0x48   : > { %vm164_vm0 = vcmask 64512   ;;  %v537_v0 = vmov 0.0  }
  0x49   : > { %165 = vst.msk [vmem:[#allocation7] sm:$0xff] %vm164_vm0, %v537_v0 }
  0x4a PF: > { %v166_v1 = vld [vmem:[%s144_s30] sm:$0xff]  ;;  %v538_v2 = vmov 0.0   ;;  %s342_s15 = scalar_lea.vmem [#allocation2], %s533_s12  ;;  %vm539_vm1 = vmmov 0   ;;  %vm246_vm2 = vcmask 64512   ;;  %p337_p6 = scmp.ne.s32.totalorder %s575_s13, 1 }
  0x4b   : > { %348 = vmatprep.subr.mxu0 %v538_v2  ;;  %v345_v3 = vld [vmem:[%s342_s15 - $0x1] ss:$0 sm:$0xff]  ;;  %350 = vmatprep.mubr.msk.f32.mxu0 %vm539_vm1, %v538_v2 }
  0x4c   : > { %v173_v4 = vmul.f32 %v345_v3, %v166_v1  ;;  %349 = vmatpush3.xpose.msra.mxu0 %v166_v1 }
  0x4f   : > { %351 = vmatmul.mubr.f32.vlgmr.msra.gmra.mxu0 %v173_v4 }
  0x50   : > { %v174_v5 = vld [vmem:[#allocation7] sm:$0xff] }
 0x10e   : > { %251 = sbr.rel (%p337_p6) target bundleno = 285 (0x11d), region = 44 }
 0x10f   : > { %v241_v6 = vpop.f32.mrf.mxu0 }
 0x110   : > { %v245_v7 = vadd.f32 %v241_v6, %v174_v5 }
 0x111   : > { %v352_v8 = vpop.f32.mrf.mxu0 }
 0x112   : > { %247 = vst.msk [vmem:[#allocation7] sm:$0xff] %vm246_vm2, %v245_v7 }
 0x119   : > { %v252_v9 = vld [vmem:[#allocation7] sm:$0xff] }
 0x11a   : > { %v253_v10 = vmul.f32 0.0009765625, %v252_v9 }
 0x11c   : > { %254 = vst.msk [vmem:[#allocation7] sm:$0xff] %vm246_vm2, %v253_v10 }
 0x11d PF: > { %p374_p13 = scmp.eq.s32.totalorder %s575_s13, 1  ;;  %s540_s12 = smov [#allocation7]  }
 0x11e   : > { %s262_s14 = sshll.u32 %s540_s12, 4  ;;  %s263_s14 = int_to_ptr.vmem [resolvable:$true] %s262_s14 }
 0x11f   : > { %s467_s3 = scalar_lea.vmem %s263_s14, 128  ;;  %p474_p12 = scmp.lt.s32.totalorder %s263_s14, %s263_s14 }
 0x120   : > { %p468_p3 = scmp.ne.s32.totalorder %s263_s14, %s467_s3  ;;  %p475_p4 = scmp.lt.s32.totalorder %s467_s3, %s467_s3 }
 0x122   : > { %p469_p7 = pnand %p468_p3, %p374_p13  ;;  %p476_p8 = por %p475_p4, %p474_p12 }
 0x124   : > { %p470_p11 = pneg %p469_p7 }
 0x126   : > { %p477_p10 = pnand %p476_p8, %p470_p11 }
 0x128   : > { %480 = shalt.err (!%p477_p10)
}
 0x129   : > { %360 = dma.vmem_to_hbm [thread:$0]  (%p374_p13), %s263_s14, 128, %s696_s2, [#allocation4]  }
 0x12a   : > { %516 = dma.done.wait (%p374_p13), [#allocation4], 128  }
 0x12b   : > { %518 = vsyncadd (%p374_p13), [#allocation4], 4294967168 }
 0x12c PF: > { %p14_p0 = scmp.ge.s32.totalorder %s595_s18, 4   ;;  %s710_s9 = smov %s525_s10 }
 0x12d   : > { %s711_s10 = smov %s529_s11  ;;  %s712_s11 = smov %s622_s26 }
 0x12e   : > { %s713_s12 = smov %s595_s18  ;;  %16 = sbr.rel (!%p14_p0) target bundleno = 5 (0x5), region = 79 }
 0x133   :  { %275 = vsyncpa [#allocation3], 1 }
 0x134   :  { %277 = vsyncpa [#allocation3 + $0x1], 1 }
 0x135   :  { %278 = vsyncpa [#allocation6], 1 }
 0x136   :  { %280 = vsyncpa [#allocation6 + $0x1], 1 }
 0x137   :  { %281 = vsyncpa [#allocation4], 1 }
 0x138   :  { %283 = vsyncpa [#allocation4 + $0x1], 1 }

</bundles_post_ra>
